<compile_context>
chip_gen: v7x
topology: tpu7x:2x2x1
jax: 0.10.0
libtpu: 0.0.40
codegen_flags: <defaults>
</compile_context>

<pallas_src>
import jax
import jax.numpy as jnp
from jax.experimental import pallas as pl
from jax.experimental.pallas import tpu as pltpu


def _attn_kernel(x_ref, w1t_ref, w2t_ref, out_ref, attn_ref):
    # One grid step handles a chunk of Bc batch elements.
    Bc, T, d_in = x_ref.shape
    n_head = w2t_ref.shape[1]

    x = x_ref[...]                       # (Bc, T, d_in), native dtype (bf16-friendly)
    w1t = w1t_ref[...]                   # (d_in, d_hidden)  -- pre-transposed in wrapper
    w2t = w2t_ref[...]                   # (d_hidden, n_head)

    # ---- first projection on the flattened slab: fills the MXU M dimension ----
    x2d = x.reshape(Bc * T, d_in)        # (Bc*T, d_in)
    h = jnp.tanh(jnp.dot(x2d, w1t, preferred_element_type=jnp.float32))  # f32 (Bc*T, d_hidden)

    # ---- second projection (feed MXU in weight dtype, accumulate f32) ----
    s = jnp.dot(h.astype(w2t.dtype), w2t, preferred_element_type=jnp.float32)  # (Bc*T, n_head)
    s = s.reshape(Bc, T, n_head)

    # ---- flip layout so T is the lane axis; softmax over T is a lane reduction ----
    s_t = jnp.transpose(s, (0, 2, 1))                     # (Bc, n_head, T)
    s_max = jnp.max(s_t, axis=-1, keepdims=True)
    e = jnp.exp(s_t - s_max)
    denom = jnp.sum(e, axis=-1, keepdims=True)
    a_t = e * pl.reciprocal(denom, approx=True)           # (Bc, n_head, T)

    # ---- output = attn^T @ x, directly in (n_head, T) x (T, d_in) layout ----
    o = jnp.einsum(
        "bht,btd->bhd",
        a_t.astype(x.dtype), x,
        preferred_element_type=jnp.float32,
    )                                                     # (Bc, n_head, d_in)

    attn_ref[...] = a_t.astype(attn_ref.dtype)            # stored as (Bc, n_head, T): lane-dense in T
    out_ref[...] = o.astype(out_ref.dtype)


def _pick_block_b(B, T, d_in, d_hidden, n_head, itemsize):
    """Pick the per-step batch chunk Bc (a divisor of B)."""
    # Approximate per-batch-element VMEM footprint of one grid step:
    # x tile + f32 intermediates (h, scores, attn) + small outputs.
    per_b = T * (d_in * itemsize + d_hidden * 4 + 2 * n_head * 4) \
            + n_head * (T + d_in) * 4
    # Keep the double-buffered pipeline comfortably inside v7x's 64 MiB physical
    # (32 MiB default scoped) VMEM; v5e/v6e have more headroom so this is safe there.
    budget = 6 * 1024 * 1024
    max_bc = max(1, budget // max(per_b, 1))
    if B >= 2:
        # Keep at least 2 grid steps so both v7x TensorCores get work.
        max_bc = min(max_bc, B // 2)
    max_bc = max(1, min(max_bc, B))
    # Largest divisor of B not exceeding max_bc -> grid tiles B exactly.
    bc = 1
    for d in range(1, max_bc + 1):
        if B % d == 0:
            bc = d
    return bc


def multi_head_self_attention(x, w1, w2, block_b=None):
    """x: (B, T, d_in), w1: (d_hidden, d_in), w2: (n_head, d_hidden).

    Returns (output, attn) matching the PyTorch module with mask=None.
    """
    B, T, d_in = x.shape
    d_hidden = w1.shape[0]
    n_head = w2.shape[0]

    # Pre-transpose weights once, HBM-side, so the kernel never relayouts them.
    w1t = jnp.swapaxes(w1, 0, 1)          # (d_in, d_hidden)
    w2t = jnp.swapaxes(w2, 0, 1)          # (d_hidden, n_head)

    bc = block_b if block_b is not None else _pick_block_b(
        B, T, d_in, d_hidden, n_head, x.dtype.itemsize)
    grid = (B // bc,)

    out, attn_t = pl.pallas_call(
        _attn_kernel,
        out_shape=(
            jax.ShapeDtypeStruct((B, n_head, d_in), x.dtype),
            jax.ShapeDtypeStruct((B, n_head, T), x.dtype),   # T on lanes inside the kernel
        ),
        grid_spec=pltpu.PrefetchScalarGridSpec(
            num_scalar_prefetch=0,
            grid=grid,
            in_specs=[
                pl.BlockSpec((bc, T, d_in), lambda b: (b, 0, 0)),
                pl.BlockSpec((d_in, d_hidden), lambda b: (0, 0)),
                pl.BlockSpec((d_hidden, n_head), lambda b: (0, 0)),
            ],
            out_specs=[
                pl.BlockSpec((bc, n_head, d_in), lambda b: (b, 0, 0)),
                pl.BlockSpec((bc, n_head, T), lambda b: (b, 0, 0)),
            ],
        ),
        compiler_params=pltpu.CompilerParams(
            dimension_semantics=("parallel",),
            vmem_limit_bytes=48 * 1024 * 1024,
        ),
    )(x, w1t, w2t)

    # Wrapper-side layout plumbing: back to the PyTorch (B, T, n_head) attn layout.
    attn = jnp.swapaxes(attn_t, 1, 2)
    if n_head == 1:
        out = jnp.squeeze(out, axis=1)
    return out, attn


def _xavier_uniform(key, shape):
    # nn.init.xavier_uniform_ on a (fan_out, fan_in) Linear weight, gain=1.
    fan_out, fan_in = shape
    bound = (6.0 / (fan_in + fan_out)) ** 0.5
    return jax.random.uniform(key, shape, dtype=jnp.float32,
                              minval=-bound, maxval=bound)


if __name__ == "__main__":
    # Small shapes consistent with the module's forward: (B, T, d_in)
    B, T, D_IN, D_HIDDEN, N_HEAD = 2, 8, 32, 32, 4

    key = jax.random.PRNGKey(0)
    kx, k1, k2 = jax.random.split(key, 3)

    x = jax.random.normal(kx, (B, T, D_IN), dtype=jnp.float32)
    w1 = _xavier_uniform(k1, (D_HIDDEN, D_IN))    # w_1.weight
    w2 = _xavier_uniform(k2, (N_HEAD, D_HIDDEN))  # w_2.weight

    out, attn = multi_head_self_attention(x, w1, w2)
    jax.block_until_ready((out, attn))

    # Pure-JAX reference check (same math, outside Pallas).
    h_ref = jnp.tanh(x @ w1.T)
    s_ref = h_ref @ w2.T
    a_ref = jax.nn.softmax(s_ref, axis=1)
    o_ref = jnp.einsum("bth,btd->bhd", a_ref, x)

    assert out.shape == (B, N_HEAD, D_IN)
    assert attn.shape == (B, T, N_HEAD)
    # Slightly loosened tolerance: softmax denominator uses the EUP approximate
    # reciprocal (pl.reciprocal(..., approx=True)).
    assert jnp.allclose(attn, a_ref, atol=2e-3, rtol=2e-3)
    assert jnp.allclose(out, o_ref, atol=2e-3, rtol=2e-3)

    print("KERNEL_OK")
</pallas_src>

<mosaic_0001>
module attributes {stable_mosaic.version = 11 : i64} {
  func.func @_attn_kernel(%arg0: i32, %arg1: memref<1x8x32xf32, #tpu.memory_space<vmem>>, %arg2: memref<32x32xf32, #tpu.memory_space<vmem>>, %arg3: memref<32x4xf32, #tpu.memory_space<vmem>>, %arg4: memref<1x4x32xf32, #tpu.memory_space<vmem>>, %arg5: memref<1x4x8xf32, #tpu.memory_space<vmem>>) attributes {dimension_semantics = [#tpu.dimension_semantics<parallel>], iteration_bounds = array<i64: 2>, scalar_prefetch = 0 : i64, scratch_operands = 0 : i64, tpu.core_type = #tpu.core_type<tc>, window_params = [{transform_indices = @transform_0, window_bounds = array<i64: 1, 8, 32>}, {pipeline_mode = #tpu.pipeline_mode<synchronous>, transform_indices = @transform_1, window_bounds = array<i64: 32, 32>}, {pipeline_mode = #tpu.pipeline_mode<synchronous>, transform_indices = @transform_2, window_bounds = array<i64: 32, 4>}, {transform_indices = @transform_3, window_bounds = array<i64: 1, 4, 32>}, {transform_indices = @transform_4, window_bounds = array<i64: 1, 4, 8>}]} {
    %c0 = arith.constant 0 : index
    %c0_0 = arith.constant 0 : index
    %c0_1 = arith.constant 0 : index
    %0 = vector.load %arg1[%c0, %c0_0, %c0_1] : memref<1x8x32xf32, #tpu.memory_space<vmem>>, vector<1x8x32xf32>
    %c0_2 = arith.constant 0 : index
    %c0_3 = arith.constant 0 : index
    %1 = vector.load %arg2[%c0_2, %c0_3] : memref<32x32xf32, #tpu.memory_space<vmem>>, vector<32x32xf32>
    %c0_4 = arith.constant 0 : index
    %c0_5 = arith.constant 0 : index
    %2 = vector.load %arg3[%c0_4, %c0_5] : memref<32x4xf32, #tpu.memory_space<vmem>>, vector<32x4xf32>
    %3 = vector.shape_cast %0 : vector<1x8x32xf32> to vector<8x32xf32>
    %cst = arith.constant dense<0.000000e+00> : vector<8x32xf32>
    %4 = tpu.matmul %3, %1, %cst {dimension_numbers = #tpu.dot_dimension_numbers<[1], [0], [0], [1], [0, 0, 1, 1], [], []>} : vector<8x32xf32>, vector<32x32xf32>, vector<8x32xf32> -> vector<8x32xf32>
    %5 = math.tanh %4 : vector<8x32xf32>
    %cst_6 = arith.constant dense<0.000000e+00> : vector<8x4xf32>
    %6 = tpu.matmul %5, %2, %cst_6 {dimension_numbers = #tpu.dot_dimension_numbers<[1], [0], [0], [1], [0, 0, 1, 1], [], []>} : vector<8x32xf32>, vector<32x4xf32>, vector<8x4xf32> -> vector<8x4xf32>
    %7 = vector.shape_cast %6 : vector<8x4xf32> to vector<1x8x4xf32>
    %8 = tpu.transpose %7, [0, 2, 1] : vector<1x8x4xf32> -> vector<1x4x8xf32>
    %cst_7 = arith.constant dense<0xFF800000> : vector<1x4xf32>
    %9 = vector.multi_reduction <maximumf>, %8, %cst_7 [2] : vector<1x4x8xf32> to vector<1x4xf32>
    %10 = vector.shape_cast %9 : vector<1x4xf32> to vector<1x4x1xf32>
    %11 = vector.broadcast %10 : vector<1x4x1xf32> to vector<1x4x8xf32>
    %12 = arith.subf %8, %11 : vector<1x4x8xf32>
    %13 = math.exp %12 : vector<1x4x8xf32>
    %cst_8 = arith.constant dense<0.000000e+00> : vector<1x4xf32>
    %14 = vector.multi_reduction <add>, %13, %cst_8 [2] : vector<1x4x8xf32> to vector<1x4xf32>
    %15 = vector.shape_cast %14 : vector<1x4xf32> to vector<1x4x1xf32>
    %16 = tpu.reciprocal %15 {approx = true} : vector<1x4x1xf32> -> vector<1x4x1xf32>
    %17 = vector.broadcast %16 : vector<1x4x1xf32> to vector<1x4x8xf32>
    %18 = arith.mulf %13, %17 : vector<1x4x8xf32>
    "tpu.trace_start"() <{level = 10 : i32, message = "bht,btd->bhd"}> : () -> ()
    %cst_9 = arith.constant dense<0.000000e+00> : vector<1x4x32xf32>
    %19 = tpu.matmul %18, %0, %cst_9 {dimension_numbers = #tpu.dot_dimension_numbers<[2], [1], [1], [2], [0, 0, 0, 1, 1, 2], [0], [0]>} : vector<1x4x8xf32>, vector<1x8x32xf32>, vector<1x4x32xf32> -> vector<1x4x32xf32>
    "tpu.trace_stop"() : () -> ()
    %c0_10 = arith.constant 0 : index
    %c0_11 = arith.constant 0 : index
    %c0_12 = arith.constant 0 : index
    %20 = vector.load %arg5[%c0_10, %c0_11, %c0_12] : memref<1x4x8xf32, #tpu.memory_space<vmem>>, vector<1x4x8xf32>
    tpu.vector_store %arg5[%c0_10, %c0_11, %c0_12], %18 {strides = array<i32>} : memref<1x4x8xf32, #tpu.memory_space<vmem>>, vector<1x4x8xf32>,
    %c0_13 = arith.constant 0 : index
    %c0_14 = arith.constant 0 : index
    %c0_15 = arith.constant 0 : index
    %21 = vector.load %arg4[%c0_13, %c0_14, %c0_15] : memref<1x4x32xf32, #tpu.memory_space<vmem>>, vector<1x4x32xf32>
    tpu.vector_store %arg4[%c0_13, %c0_14, %c0_15], %19 {strides = array<i32>} : memref<1x4x32xf32, #tpu.memory_space<vmem>>, vector<1x4x32xf32>,
    return
  }
  func.func @transform_0(%arg0: i32) -> (i32, i32, i32) {
    %c0_i32 = arith.constant 0 : i32
    %c0_i32_0 = arith.constant 0 : i32
    %c0_i32_1 = arith.constant 0 : i32
    return %arg0, %c0_i32, %c0_i32_0 : i32, i32, i32
  }
  func.func @transform_1(%arg0: i32) -> (i32, i32) {
    %c0_i32 = arith.constant 0 : i32
    %c0_i32_0 = arith.constant 0 : i32
    %c0_i32_1 = arith.constant 0 : i32
    return %c0_i32, %c0_i32_0 : i32, i32
  }
  func.func @transform_2(%arg0: i32) -> (i32, i32) {
    %c0_i32 = arith.constant 0 : i32
    %c0_i32_0 = arith.constant 0 : i32
    %c0_i32_1 = arith.constant 0 : i32
    return %c0_i32, %c0_i32_0 : i32, i32
  }
  func.func @transform_3(%arg0: i32) -> (i32, i32, i32) {
    %c0_i32 = arith.constant 0 : i32
    %c0_i32_0 = arith.constant 0 : i32
    %c0_i32_1 = arith.constant 0 : i32
    return %arg0, %c0_i32, %c0_i32_0 : i32, i32, i32
  }
  func.func @transform_4(%arg0: i32) -> (i32, i32, i32) {
    %c0_i32 = arith.constant 0 : i32
    %c0_i32_0 = arith.constant 0 : i32
    %c0_i32_1 = arith.constant 0 : i32
    return %arg0, %c0_i32, %c0_i32_0 : i32, i32, i32
  }
}

</mosaic_0001>

<bundles_post_ra>
// kernel: tpu_custom_call.1
= control target key start
LH: loop header
LB: loop body
LE: loop exit
PB: predicated region body
PF: predicated region fallthrough
CT: control target
= control target key end

     0   :  { %10 = vsyncpa [#allocation3], 0  ;;  %s1151_s0 = inlined_call_operand.hbm [shape: f32[2,8,32], index: 0, kind: input, shape index: {}]   ;;  %s1152_s1 = inlined_call_operand.vmem [shape: f32[32,32], index: 1, kind: input, shape index: {}]   ;;  %s1153_s2 = inlined_call_operand.vmem [shape: f32[32,4], index: 2, kind: input, shape index: {}]   ;;  %s1154_s3 = inlined_call_operand.hbm [shape: f32[2,4,32], index: 3, kind: output, shape index: {0}]   ;;  %s1155_s4 = inlined_call_operand.hbm [shape: f32[2,4,8], index: 4, kind: output, shape index: {1}]  }
   0x1   :  { %12 = vsyncpa [#allocation3 + $0x1], 0 }
   0x2   :  { %13 = vsyncpa [#allocation4], 0 }
   0x3   :  { %15 = vsyncpa [#allocation4 + $0x1], 0 }
   0x4   :  { %16 = vsyncpa [#allocation7], 0 }
   0x5   :  { %18 = vsyncpa [#allocation7 + $0x1], 0  ;;  %s926_s15 = smov 0   ;;  %s928_s16 = smov 0  }
   0x6   :  { %s930_s17 = smov 0   ;;  %s932_s18 = smov 0  }
   0x7 LB: > { %s947_s19 = sadd.s32 4294967295, %s893_s18   ;;  %s636_s20 = sadd.s32 4294967294, %s893_s18   ;;  %s893_s18 = sphi %s932_s18, %s1170_s18   ;;  %s889_s17 = sphi %s930_s17, %s1169_s17   ;;  %s885_s16 = sphi %s928_s16, %s1168_s16   ;;  %s881_s15 = sphi %s926_s15, %s1167_s15  }
   0x8   : > { %s951_s21 = sadd.s32 1, %s893_s18   ;;  %s31_s22 = sadd.s32 1, %s889_s17 }
   0x9   : > { %s28_s23 = ssub.s32 %s893_s18, %s951_s21  ;;  %p38_p0 = scmp.ne.s32.totalorder %s889_s17, %s885_s16 }
   0xa   : > { %p29_p1 = scmp.eq.s32.totalorder %s28_s23, 0  ;;  %p39_p2 = scmp.eq.s32.totalorder %s893_s18, 0 }
   0xb   : > { %p44_p3 = scmp.ne.s32.totalorder %s885_s16, %s881_s15  ;;  %p45_p4 = scmp.eq.s32.totalorder %s947_s19, 0 }
   0xc   : > { %s963_s24 = scalar_select %p29_p1, %s889_s17, %s31_s22  }
   0xd   : > { %p965_p5 = por %p39_p2, %p38_p0  ;;  %p969_p6 = por %p45_p4, %p44_p3 }
   0xe   : > { %p110_p7 = scmp.eq.s32.totalorder %s947_s19, 1  ;;  %p116_p8 = scmp.eq.s32.totalorder %s636_s20, 1 }
   0xf   : > { %p722_p10 = scmp.lt.s32.totalorder %s893_s18, 2  ;;  %s168_s29 = sand.u32 1, %s889_s17  }
  0x10   : > { %p976_p11 = por %p110_p7, %p38_p0  ;;  %p980_p12 = por %p116_p8, %p44_p3 }
  0x11   : > { %s640_s30 = sshll.u32 %s893_s18, 7  ;;  %s639_s5 = sshll.u32 %s168_s29, 3 }
  0x12   : > { %s1159_s27 = scalar_select %p976_p11, 1, 0 }
  0x13   : > { %s1160_s28 = scalar_select %p980_p12, 1, 0 }
  0x14   : > { %s989_s8 = scalar_lea.hbm %s1151_s0, %s640_s30  ;;  %s172_s9 = scalar_lea.vmem [#allocation2], %s639_s5 }
  0x15   : > { %s179_s10 = sshll.u32 %s172_s9, 4  ;;  %p993_p13 = pnand %p722_p10, %p965_p5  ;;  %s997_s10 = int_to_ptr.vmem [resolvable:$true] %s179_s10 }
  0x16   : > { %s169_s12 = scalar_lea.sflag [#allocation3], %s168_s29  ;;  %s765_s13 = scalar_lea.hbm %s989_s8, 128 }
  0x17   : > { %p766_p2 = scmp.ne.s32.totalorder %s989_s8, %s765_s13  ;;  %p767_p3 = pneg %p993_p13 }
  0x18   : > { %s770_s22 = scalar_lea.hbm %s1151_s0, 256  ;;  %p771_p5 = scmp.lt.u32.totalorder %s989_s8, %s1151_s0 }
  0x19   : > { %p768_p4 = pnand %p767_p3, %p766_p2  ;;  %p772_p8 = scmp.lt.u32.totalorder %s770_s22, %s765_s13 }
  0x1a   : > { %p774_p9 = scmp.lt.u32.totalorder %s765_s13, %s989_s8 }
  0x1b   : > { %p769_p7 = pneg %p768_p4  ;;  %p773_p10 = por %p772_p8, %p771_p5 }
  0x1d   : > { %p775_p0 = por %p774_p9, %p773_p10 }
  0x1f   : > { %p776_p1 = pnand %p775_p0, %p769_p7 }
  0x21   : > { %779 = shalt.err (!%p776_p1)
}
  0x22   : > { %s780_s29 = scalar_lea.vmem %s997_s10, 128  ;;  %s895_s30 = smov [#allocation2]  }
  0x23   : > { %p781_p2 = scmp.ne.s32.totalorder %s997_s10, %s780_s29  ;;  %s785_s5 = sshll.u32 %s895_s30, 4  ;;  %s786_s5 = int_to_ptr.vmem [resolvable:$false] %s785_s5 }
  0x24   : > { %s787_s6 = scalar_lea.vmem %s786_s5, 256  ;;  %p788_p11 = scmp.lt.s32.totalorder %s997_s10, %s786_s5 }
  0x25   : > { %p783_p4 = pnand %p781_p2, %p767_p3  ;;  %p789_p5 = scmp.lt.s32.totalorder %s787_s6, %s780_s29 }
  0x27   : > { %p784_p12 = pneg %p783_p4  ;;  %p790_p8 = por %p789_p5, %p788_p11 }
  0x29   : > { %p791_p9 = pnand %p790_p8, %p784_p12 }
  0x2b   : > { %794 = shalt.err (!%p791_p9)
}
  0x2c   : > { %714 = dma.hbm_to_vmem [thread:$0]  (!%p993_p13), %s989_s8, 128, %s997_s10, %s169_s12  }
  0x2d   : > { %p1162_p0 = scmp.lt.s32.totalorder %s893_s18, 3  ;;  %p1163_p1 = scmp.ge.s32.totalorder %s893_s18, 1 }
  0x2f   : > { %p185_p3 = pnand %p1163_p1, %p1162_p0 }
  0x30   : > { %s1031_s7 = sand.u32 (!%p185_p3), 1, %s885_s16  }
  0x31   : > { %188 = sbr.rel (%p185_p3) target bundleno = 1171 (0x493), region = 32  ;;  %s642_s9 = sshll.u32 (!%p185_p3), %s1031_s7, 3 }
  0x32   : > { %s191_s13 = scalar_lea.sflag (!%p185_p3), [#allocation3], %s1031_s7  ;;  %s194_s14 = scalar_lea.vmem (!%p185_p3), [#allocation2], %s642_s9 }
  0x38   : > { %868 = dma.done.wait (%p969_p6), %s191_s13, 128  }
  0x39   : > { %870 = vsyncadd (%p969_p6), %s191_s13, 4294967168  ;;  %v896_v0 = vmov 0.0|0.0   ;;  %vm897_vm0 = vmmov 0   ;;  %v898_v1 = vmov 0.0   ;;  %v225_v2 = vld [vmem:[%s1152_s1] sm:$0xff]  ;;  %v226_v3 = vld [vmem:[%s1152_s1 + $0x8] sm:$0xff] }
  0x3a   : > { %693 = vmatprep.subr.bf16.mxu0 %v896_v0  ;;  %674 = vmatprep.mubr.msk.f32.mxu0 %vm897_vm0, %v898_v1  ;;  %v227_v4 = vld [vmem:[%s1152_s1 + $0x10] sm:$0xff]  ;;  %v694_v5 = vpack.c.bf16 %v226_v3, %v225_v2  ;;  %v228_v6 = vld [vmem:[%s1152_s1 + $0x18] sm:$0xff]  ;;  %v224_v8 = vld [vmem:[%s194_s14] sm:$0xff]  ;;  %vm233_vm1 = vcmask 261120   ;;  %vm413_vm2 = vcmask 60416   ;;  %s643_s8 = sshll.u32 %s1031_s7, 2 }
  0x3b   : > { %699 = vmatprep.subr.bf16.mxu1 %v896_v0  ;;  %685 = vmatprep.mubr.msk.f32.mxu1 %vm897_vm0, %v898_v1  ;;  %v697_v7 = vpack.c.bf16 %v228_v6, %v227_v4  ;;  %v229_v9 = vld [vmem:[%s1153_s2] sm:$0xff]  ;;  %v230_v10 = vld [vmem:[%s1153_s2 + $0x8] sm:$0xff]  ;;  %v231_v11 = vld [vmem:[%s1153_s2 + $0x10] sm:$0xff]  ;;  %vm425_vm3 = vcmask 64512   ;;  %s223_s10 = scalar_lea.vmem [#allocation6], %s643_s8  ;;  %s650_s11 = sshll.u32 %s947_s19, 6 }
  0x3c   : > { %695 = vmatpush3.bf16.msra.mxu0 %v694_v5  ;;  %v700_v12 = vpack.c.bf16 %v230_v10, %v229_v9  ;;  %v232_v13 = vld [vmem:[%s1153_s2 + $0x18] sm:$0xff]  ;;  %s1080_s26 = scalar_lea.hbm %s1155_s4, %s650_s11  ;;  %s534_s22 = sshll.u32 %s223_s10, 4  ;;  %s535_s22 = int_to_ptr.vmem [resolvable:$true] %s534_s22 }
  0x3d   : > { %696 = vmatprep.subr.bf16.mxu0 %v896_v0  ;;  %v703_v14 = vpack.c.bf16 %v232_v13, %v231_v11  ;;  %s508_s23 = scalar_lea.sflag [#allocation7], %s1031_s7  ;;  %s795_s25 = scalar_lea.vmem %s535_s22, 64 }
  0x3e   : > { %701 = vmatpush3.bf16.msra.mxu1 %v700_v12  ;;  %p796_p6 = scmp.ne.s32.totalorder %s535_s22, %s795_s25  ;;  %p1164_p11 = scmp.ne.s32.totalorder %s1159_s27, 0 }
  0x3f   : > { %702 = vmatprep.subr.bf16.mxu1 %v896_v0  ;;  %s899_s29 = smov [#allocation6]  }
  0x40   : > { %698 = vmatpush3.bf16.msra.mxu0 %v697_v7  ;;  %p797_p12 = pnand %p796_p6, %p1164_p11  ;;  %s799_s30 = sshll.u32 %s899_s29, 4  ;;  %s800_s30 = int_to_ptr.vmem [resolvable:$false] %s799_s30 }
  0x41   : > { %688 = vmatprep.subr.mxu0 %v898_v1  ;;  %s801_s5 = scalar_lea.vmem %s800_s30, 128  ;;  %p802_p7 = scmp.lt.s32.totalorder %s535_s22, %s800_s30 }
  0x42   : > { %704 = vmatpush3.bf16.msra.mxu1 %v703_v14  ;;  %p798_p13 = pneg %p797_p12  ;;  %p803_p10 = scmp.lt.s32.totalorder %s801_s5, %s795_s25 }
  0x43   : > { %675 = vmatmul.mubr.msk.f32.vlgmr.msra.gmra.mrb[0].mxu0 %vm233_vm1, %v224_v8 }
  0x44   : > { %689 = vmatpush3.msra.mxu0 %v224_v8  ;;  %690 = vmatprep.mubr.msk.f32.mxu0 %vm897_vm0, %v898_v1  ;;  %p804_p2 = por %p803_p10, %p802_p7 }
  0x46   : > { %p805_p4 = pnand %p804_p2, %p798_p13 }
 0x116   : > { %v303_v15 = vpop.f32.mrb[0].mxu0 }
 0x117   : > { %759 = vtanh.f32 %v303_v15  ;;  %v676_v16 = vpop.f32.mrb[1].mxu0 }
 0x121   : > { %v760_v17 = vpop.eup %759 }
 0x122   : > { %686 = vmatmul.mubr.msk.f32.vlgmr.msra.gmra.mrb[0].mxu1 %vm233_vm1, %v760_v17 }
 0x1f5   : > { %v377_v18 = vpop.f32.mrb[0].mxu1 }
 0x1f6   : > { %381 = vxpose.xlu0.b32.start.end [1/1] (short) (narrow) %v377_v18, 8  ;;  %v687_v19 = vpop.f32.mrb[1].mxu1 }
 0x276   : > { %v397_v20 = vpop.trf.xlu0 }
 0x277   : > { %v414_v21 = vsel %vm413_vm2, %v397_v20, -inf }
 0x278   : > { %415 = vmax.xlane.f32.xlu0 %v414_v21 }
 0x305   : > { %v416_v22 = vpop.xlane.xlu0 %415 }
 0x306   : > { %v417_v23 = vsub.f32 %v397_v20, %v416_v22 }
 0x308   : > { %v418_v24 = vmul.f32 1.442695, %v417_v23 }
 0x30a   : > { %761 = vpow2.f32 %v418_v24 }
 0x314   : > { %v762_v25 = vpop.eup %761 }
 0x315   : > { %v420_v26 = vsel %vm413_vm2, %v762_v25, 0.0 }
 0x316   : > { %421 = vadd.xlane.f32.xlu1 %v420_v26 }
 0x3a3   : > { %v422_v27 = vpop.xlane.xlu1 %421 }
 0x3a4   : > { %763 = vrcp.f32 %v422_v27 }
 0x3ae   : > { %v764_v28 = vpop.eup %763 }
 0x3af   : > { %v424_v29 = vmul.f32 %v764_v28, %v762_v25 }
 0x3b1   : > { %691 = vmatmul.mubr.msk.f32.vlgmr.msra.gmra.mrb[2].mxu0 %vm425_vm3, %v424_v29  ;;  %499 = vst.msk [vmem:[%s223_s10] sm:$0xf] %vm413_vm2, %v424_v29 }
 0x3b2   : > { %808 = shalt.err (!%p805_p4)
}
 0x3b3   : > { %s809_s6 = scalar_lea.hbm %s1080_s26, 64  ;;  %s813_s14 = scalar_lea.hbm %s1155_s4, 128 }
 0x3b4   : > { %p810_p5 = scmp.ne.s32.totalorder %s1080_s26, %s809_s6  ;;  %p814_p0 = scmp.lt.u32.totalorder %s1080_s26, %s1155_s4 }
 0x3b5   : > { %p815_p1 = scmp.lt.u32.totalorder %s813_s14, %s809_s6  ;;  %p817_p6 = scmp.lt.u32.totalorder %s809_s6, %s1080_s26 }
 0x3b6   : > { %p811_p8 = pnand %p810_p5, %p1164_p11 }
 0x3b7   : > { %p816_p3 = por %p815_p1, %p814_p0 }
 0x3b8   : > { %p812_p9 = pneg %p811_p8 }
 0x3b9   : > { %p818_p12 = por %p817_p6, %p816_p3 }
 0x3bb   : > { %p819_p13 = pnand %p818_p12, %p812_p9 }
 0x3bd   : > { %822 = shalt.err (!%p819_p13)
}
 0x3be   : > { %708 = dma.vmem_to_hbm [thread:$0]  (%p1164_p11), %s535_s22, 64, %s1080_s26, %s508_s23   ;;  %vm500_vm4 = vcmask 257024  }
 0x3bf   : > { %s216_s20 = scalar_lea.vmem [#allocation5], %s643_s8  ;;  %s1107_s5 = scalar_lea.hbm %s1154_s3, %s650_s11 }
 0x3c0   : > { %s521_s25 = sshll.u32 %s216_s20, 4  ;;  %s503_s6 = scalar_lea.sflag [#allocation4], %s1031_s7  ;;  %s1109_s25 = int_to_ptr.vmem [resolvable:$true] %s521_s25 }
 0x3c1   : > { %s823_s26 = scalar_lea.vmem %s1109_s25, 64  ;;  %s900_s19 = smov [#allocation5]  }
 0x3c2   : > { %p824_p7 = scmp.ne.s32.totalorder %s1109_s25, %s823_s26  ;;  %s827_s8 = sshll.u32 %s900_s19, 4  ;;  %s828_s8 = int_to_ptr.vmem [resolvable:$false] %s827_s8 }
 0x3c3   : > { %s829_s22 = scalar_lea.vmem %s828_s8, 128  ;;  %p830_p4 = scmp.lt.s32.totalorder %s1109_s25, %s828_s8 }
 0x3c4   : > { %p825_p10 = pnand %p824_p7, %p1164_p11  ;;  %p831_p5 = scmp.lt.s32.totalorder %s829_s22, %s823_s26 }
 0x3c6   : > { %p826_p2 = pneg %p825_p10  ;;  %p832_p8 = por %p831_p5, %p830_p4 }
 0x3c8   : > { %p833_p9 = pnand %p832_p8, %p826_p2 }
 0x484   : > { %v495_v30 = vpop.f32.mrb[2].mxu0 }
 0x485   : > { %501 = vst.msk [vmem:[%s216_s20] sm:$0xf] %vm500_vm4, %v495_v30  ;;  %v692_v31 = vpop.f32.mrb[3].mxu0 }
 0x486   : > { %836 = shalt.err (!%p833_p9)
}
 0x487   : > { %s837_s7 = scalar_lea.hbm %s1107_s5, 64  ;;  %s841_s9 = scalar_lea.hbm %s1154_s3, 128 }
 0x488   : > { %p838_p0 = scmp.ne.s32.totalorder %s1107_s5, %s837_s7  ;;  %p842_p6 = scmp.lt.u32.totalorder %s1107_s5, %s1154_s3 }
 0x489   : > { %p843_p12 = scmp.lt.u32.totalorder %s841_s9, %s837_s7  ;;  %p845_p7 = scmp.lt.u32.totalorder %s837_s7, %s1107_s5 }
 0x48a   : > { %p839_p1 = pnand %p838_p0, %p1164_p11 }
 0x48b   : > { %p844_p13 = por %p843_p12, %p842_p6 }
 0x48c   : > { %p840_p3 = pneg %p839_p1 }
 0x48d   : > { %p846_p10 = por %p845_p7, %p844_p13 }
 0x48f   : > { %p847_p2 = pnand %p846_p10, %p840_p3 }
 0x491   : > { %850 = shalt.err (!%p847_p2)
}
 0x492   : > { %707 = dma.vmem_to_hbm [thread:$0]  (%p1164_p11), %s1109_s25, 64, %s1107_s5, %s503_s6  }
 0x493 PF: > { %s546_s10 = sand.u32 1, %s881_s15   ;;  %p1165_p4 = scmp.ne.s32.totalorder %s1160_s28, 0 }
 0x494   : > { %p1166_p5 = scmp.ge.s32.totalorder %s893_s18, 2  ;;  %s547_s12 = scalar_lea.sflag [#allocation4], %s546_s10 }
 0x496   : > { %p716_p8 = pnand %p1166_p5, %p1165_p4 }
 0x498   : > { %872 = dma.done.wait (!%p716_p8), %s547_s12, 64  }
 0x499   : > { %874 = vsyncadd (!%p716_p8), %s547_s12, 4294967232  ;;  %s556_s20 = scalar_lea.sflag [#allocation7], %s546_s10 }
 0x49a   : > { %876 = dma.done.wait (!%p716_p8), %s556_s20, 64  }
 0x49b   : > { %878 = vsyncadd (!%p716_p8), %s556_s20, 4294967232  ;;  %p21_p11 = scmp.ge.s32.totalorder %s951_s21, 4   ;;  %s1167_s15 = smov %s885_s16 }
 0x49c   : > { %s1168_s16 = smov %s889_s17  ;;  %s1169_s17 = smov %s963_s24 }
 0x49d   : > { %s1170_s18 = smov %s951_s21  ;;  %23 = sbr.rel (!%p21_p11) target bundleno = 7 (0x7), region = 94 }
 0x4a4   :  { %561 = vsyncpa [#allocation3], 1 }
 0x4a5   :  { %563 = vsyncpa [#allocation3 + $0x1], 1 }
 0x4a6   :  { %564 = vsyncpa [#allocation4], 1 }
 0x4a7   :  { %566 = vsyncpa [#allocation4 + $0x1], 1 }
 0x4a8   :  { %567 = vsyncpa [#allocation7], 1 }
 0x4a9   :  { %569 = vsyncpa [#allocation7 + $0x1], 1 }

</bundles_post_ra>
